<compile_context>
chip_gen: v6e
topology: v6e:2x2x1
jax: 0.10.0
libtpu: 0.0.40
codegen_flags: <defaults>
</compile_context>

<pallas_src>
import math
import jax
import jax.numpy as jnp
from jax.experimental import pallas as pl
from jax.experimental.pallas import tpu as pltpu

# ----------------------- problem sizes (small, synthetic) -----------------------
N = 64            # number of graph nodes
IN_CH = 16        # in_channels
HIDDEN = 32       # args.hidden
OUT_CH = 8        # out_channels
K = 3             # args.K  (Bernstein polynomial order)
LANE = 128        # TPU lane width; node axis is padded to a multiple of this


# ----------------------------- Pallas kernel -------------------------------------
def make_fused_kernel(k_order):
    """Fused MLP + Bernstein propagation, transposed (lane-dense) layout."""
    coefs = [math.comb(k_order, k) / (2.0 ** k_order) for k in range(k_order + 1)]

    def fused_kernel(temp_ref, xT_ref, w1T_ref, b1T_ref, w2T_ref, b2T_ref,
                     l_ref, o_ref):
        # scaled Bernstein coefficients s_k = C(K,k)/2^K * relu(temp_k)
        # (SMEM scalars, computed once -> no per-term re-broadcast)
        s = [coefs[k] * jnp.maximum(temp_ref[k], 0.0) for k in range(k_order + 1)]

        # ---- fused MLP in transposed layout: lane dim = padded node dim ----
        h = jnp.dot(w1T_ref[...], xT_ref[...], preferred_element_type=jnp.float32)
        h = jnp.maximum(h + b1T_ref[...], 0.0)                       # [HIDDEN, Np]
        h = jnp.dot(w2T_ref[...], h, preferred_element_type=jnp.float32) \
            + b2T_ref[...]                                           # [OUT_CH, Np]

        # ---- Bernstein propagation (L symmetric -> right-multiply when transposed) ----
        L = l_ref[...]

        # M^p h with M = 2I - L  =>  mp[p] = 2*mp[p-1] - mp[p-1] @ L  (no dense M operand)
        mp = [h]
        for _ in range(k_order):
            prev = mp[-1]
            mp.append(2.0 * prev -
                      jnp.dot(prev, L, preferred_element_type=jnp.float32))

        # Horner over L:  out = sum_i s_i * L^i M^{K-i} h   (K more matmuls)
        acc = s[k_order] * mp[0]
        for j in range(k_order - 1, -1, -1):
            acc = jnp.dot(acc, L, preferred_element_type=jnp.float32) \
                  + s[j] * mp[k_order - j]

        o_ref[...] = acc.astype(o_ref.dtype)

    return fused_kernel


# ------------------------------- wrapper -----------------------------------------
def bernnet_conv_forward(x, L, params, k_order):
    n = x.shape[0]
    out_ch = params["w2"].shape[1]
    n_pad = ((n + LANE - 1) // LANE) * LANE

    # Transpose + pad so the node axis sits on the 128-wide lane dimension.
    # Padded L rows/cols are zero, so real-node results are unaffected.
    xT = jnp.zeros((x.shape[1], n_pad), jnp.float32).at[:, :n].set(x.T)
    L_pad = jnp.zeros((n_pad, n_pad), jnp.float32).at[:n, :n].set(L)
    w1T = params["w1"].T                 # [HIDDEN, IN_CH]
    b1T = params["b1"].T                 # [HIDDEN, 1]
    w2T = params["w2"].T                 # [OUT_CH, HIDDEN]
    b2T = params["b2"].T                 # [OUT_CH, 1]

    vmem = pl.BlockSpec(memory_space=pltpu.MemorySpace.VMEM)
    smem = pl.BlockSpec(memory_space=pltpu.MemorySpace.SMEM)

    # TODO(synk): for large N, tile L over a grid (rows "parallel", reduction
    # "arbitrary") and cast L/h to bf16 with f32 accumulation; at N=64 everything
    # fits trivially in VMEM so a single ungridded call is optimal.
    outT = pl.pallas_call(
        make_fused_kernel(k_order),
        out_shape=jax.ShapeDtypeStruct((out_ch, n_pad), jnp.float32),
        in_specs=[smem, vmem, vmem, vmem, vmem, vmem, vmem],
        out_specs=vmem,
    )(params["temp"], xT, w1T, b1T, w2T, b2T, L_pad)

    return outT[:, :n].T                 # back to node-major [N, OUT_CH]


# -------------------- graph operator construction (plain-JAX glue) ---------------
def build_laplacians(edge_index, num_nodes):
    """Dense sym-normalized Laplacian L = I - D^-1/2 A D^-1/2 and M = 2I - L."""
    src, dst = edge_index
    A = jnp.zeros((num_nodes, num_nodes), jnp.float32).at[src, dst].set(1.0)
    deg = A.sum(axis=1)
    dinv = jnp.where(deg > 0, jax.lax.rsqrt(deg), 0.0)
    A_norm = dinv[:, None] * A * dinv[None, :]
    eye = jnp.eye(num_nodes, dtype=jnp.float32)
    L = eye - A_norm
    M = 2.0 * eye - L
    return L, M


# ------------------------------ reference (jnp) ----------------------------------
def reference_forward(x, L, M, params, k_order):
    h = jnp.maximum(x @ params["w1"] + params["b1"], 0.0)
    h = h @ params["w2"] + params["b2"]
    temps = jnp.maximum(params["temp"], 0.0)
    tmp = [h]
    for _ in range(k_order):
        tmp.append(M @ tmp[-1])
    out = math.comb(k_order, 0) / 2 ** k_order * temps[0] * tmp[k_order]
    for i in range(k_order):
        xi = tmp[k_order - i - 1]
        for _ in range(i + 1):
            xi = L @ xi
        out = out + math.comb(k_order, i + 1) / 2 ** k_order * temps[i + 1] * xi
    return out


# ------------------------------------ main ---------------------------------------
if __name__ == "__main__":
    key = jax.random.PRNGKey(0)
    k_x, k_w1, k_b1, k_w2, k_b2, k_e = jax.random.split(key, 6)

    # deterministic parameters (shapes from __init__; 'Random' init -> temp = ones(K+1))
    params = {
        "w1": jax.random.normal(k_w1, (IN_CH, HIDDEN), jnp.float32) * 0.1,
        "b1": jax.random.normal(k_b1, (1, HIDDEN), jnp.float32) * 0.1,
        "w2": jax.random.normal(k_w2, (HIDDEN, OUT_CH), jnp.float32) * 0.1,
        "b2": jax.random.normal(k_b2, (1, OUT_CH), jnp.float32) * 0.1,
        "temp": jnp.ones((K + 1,), jnp.float32),
    }

    # node features
    x = jax.random.normal(k_x, (N, IN_CH), jnp.float32)

    # synthetic undirected graph: ring + random symmetric edges
    ring_src = jnp.arange(N)
    ring_dst = (ring_src + 1) % N
    rnd_src = jax.random.randint(k_e, (64,), 0, N)
    rnd_dst = jax.random.randint(jax.random.fold_in(k_e, 1), (64,), 0, N)
    src = jnp.concatenate([ring_src, ring_dst, rnd_src, rnd_dst])
    dst = jnp.concatenate([ring_dst, ring_src, rnd_dst, rnd_src])
    edge_index = jnp.stack([src, dst])

    L, M = build_laplacians(edge_index, N)

    out = bernnet_conv_forward(x, L, params, K)
    out = jax.block_until_ready(out)

    ref = reference_forward(x, L, M, params, K)
    assert out.shape == (N, OUT_CH)
    assert jnp.allclose(out, ref, atol=1e-4, rtol=1e-4)

    print("KERNEL_OK")
</pallas_src>

<mosaic_0001>
module attributes {stable_mosaic.version = 11 : i64} {
  func.func @fused_kernel(%arg0: memref<4xf32, #tpu.memory_space<smem>>, %arg1: memref<16x128xf32, #tpu.memory_space<vmem>>, %arg2: memref<32x16xf32, #tpu.memory_space<vmem>>, %arg3: memref<32x1xf32, #tpu.memory_space<vmem>>, %arg4: memref<8x32xf32, #tpu.memory_space<vmem>>, %arg5: memref<8x1xf32, #tpu.memory_space<vmem>>, %arg6: memref<128x128xf32, #tpu.memory_space<vmem>>, %arg7: memref<8x128xf32, #tpu.memory_space<vmem>>) attributes {dimension_semantics = [], scalar_prefetch = 0 : i64, scratch_operands = 0 : i64, tpu.core_type = #tpu.core_type<tc>} {
    %c0 = arith.constant 0 : index
    %0 = memref.load %arg0[%c0] : memref<4xf32, #tpu.memory_space<smem>>
    %cst = arith.constant 0.000000e+00 : f32
    %1 = arith.maximumf %0, %cst : f32
    %cst_0 = arith.constant 1.250000e-01 : f32
    %2 = arith.mulf %cst_0, %1 : f32
    %c1 = arith.constant 1 : index
    %3 = memref.load %arg0[%c1] : memref<4xf32, #tpu.memory_space<smem>>
    %cst_1 = arith.constant 0.000000e+00 : f32
    %4 = arith.maximumf %3, %cst_1 : f32
    %cst_2 = arith.constant 3.750000e-01 : f32
    %5 = arith.mulf %cst_2, %4 : f32
    %c2 = arith.constant 2 : index
    %6 = memref.load %arg0[%c2] : memref<4xf32, #tpu.memory_space<smem>>
    %cst_3 = arith.constant 0.000000e+00 : f32
    %7 = arith.maximumf %6, %cst_3 : f32
    %cst_4 = arith.constant 3.750000e-01 : f32
    %8 = arith.mulf %cst_4, %7 : f32
    %c3 = arith.constant 3 : index
    %9 = memref.load %arg0[%c3] : memref<4xf32, #tpu.memory_space<smem>>
    %cst_5 = arith.constant 0.000000e+00 : f32
    %10 = arith.maximumf %9, %cst_5 : f32
    %cst_6 = arith.constant 1.250000e-01 : f32
    %11 = arith.mulf %cst_6, %10 : f32
    %c0_7 = arith.constant 0 : index
    %c0_8 = arith.constant 0 : index
    %12 = vector.load %arg2[%c0_7, %c0_8] : memref<32x16xf32, #tpu.memory_space<vmem>>, vector<32x16xf32>
    %c0_9 = arith.constant 0 : index
    %c0_10 = arith.constant 0 : index
    %13 = vector.load %arg1[%c0_9, %c0_10] : memref<16x128xf32, #tpu.memory_space<vmem>>, vector<16x128xf32>
    %cst_11 = arith.constant dense<0.000000e+00> : vector<32x128xf32>
    %14 = tpu.matmul %12, %13, %cst_11 {dimension_numbers = #tpu.dot_dimension_numbers<[1], [0], [0], [1], [0, 0, 1, 1], [], []>} : vector<32x16xf32>, vector<16x128xf32>, vector<32x128xf32> -> vector<32x128xf32>
    %c0_12 = arith.constant 0 : index
    %c0_13 = arith.constant 0 : index
    %15 = vector.load %arg3[%c0_12, %c0_13] : memref<32x1xf32, #tpu.memory_space<vmem>>, vector<32x1xf32>
    %16 = vector.broadcast %15 : vector<32x1xf32> to vector<32x128xf32>
    %17 = arith.addf %14, %16 : vector<32x128xf32>
    %cst_14 = arith.constant 0.000000e+00 : f32
    %18 = vector.broadcast %cst_14 : f32 to vector<32x128xf32>
    %19 = arith.maximumf %17, %18 : vector<32x128xf32>
    %c0_15 = arith.constant 0 : index
    %c0_16 = arith.constant 0 : index
    %20 = vector.load %arg4[%c0_15, %c0_16] : memref<8x32xf32, #tpu.memory_space<vmem>>, vector<8x32xf32>
    %cst_17 = arith.constant dense<0.000000e+00> : vector<8x128xf32>
    %21 = tpu.matmul %20, %19, %cst_17 {dimension_numbers = #tpu.dot_dimension_numbers<[1], [0], [0], [1], [0, 0, 1, 1], [], []>} : vector<8x32xf32>, vector<32x128xf32>, vector<8x128xf32> -> vector<8x128xf32>
    %c0_18 = arith.constant 0 : index
    %c0_19 = arith.constant 0 : index
    %22 = vector.load %arg5[%c0_18, %c0_19] : memref<8x1xf32, #tpu.memory_space<vmem>>, vector<8x1xf32>
    %23 = vector.broadcast %22 : vector<8x1xf32> to vector<8x128xf32>
    %24 = arith.addf %21, %23 : vector<8x128xf32>
    %c0_20 = arith.constant 0 : index
    %c0_21 = arith.constant 0 : index
    %25 = vector.load %arg6[%c0_20, %c0_21] : memref<128x128xf32, #tpu.memory_space<vmem>>, vector<128x128xf32>
    %cst_22 = arith.constant 2.000000e+00 : f32
    %26 = vector.broadcast %cst_22 : f32 to vector<8x128xf32>
    %27 = arith.mulf %26, %24 : vector<8x128xf32>
    %cst_23 = arith.constant dense<0.000000e+00> : vector<8x128xf32>
    %28 = tpu.matmul %24, %25, %cst_23 {dimension_numbers = #tpu.dot_dimension_numbers<[1], [0], [0], [1], [0, 0, 1, 1], [], []>} : vector<8x128xf32>, vector<128x128xf32>, vector<8x128xf32> -> vector<8x128xf32>
    %29 = arith.subf %27, %28 : vector<8x128xf32>
    %cst_24 = arith.constant 2.000000e+00 : f32
    %30 = vector.broadcast %cst_24 : f32 to vector<8x128xf32>
    %31 = arith.mulf %30, %29 : vector<8x128xf32>
    %cst_25 = arith.constant dense<0.000000e+00> : vector<8x128xf32>
    %32 = tpu.matmul %29, %25, %cst_25 {dimension_numbers = #tpu.dot_dimension_numbers<[1], [0], [0], [1], [0, 0, 1, 1], [], []>} : vector<8x128xf32>, vector<128x128xf32>, vector<8x128xf32> -> vector<8x128xf32>
    %33 = arith.subf %31, %32 : vector<8x128xf32>
    %cst_26 = arith.constant 2.000000e+00 : f32
    %34 = vector.broadcast %cst_26 : f32 to vector<8x128xf32>
    %35 = arith.mulf %34, %33 : vector<8x128xf32>
    %cst_27 = arith.constant dense<0.000000e+00> : vector<8x128xf32>
    %36 = tpu.matmul %33, %25, %cst_27 {dimension_numbers = #tpu.dot_dimension_numbers<[1], [0], [0], [1], [0, 0, 1, 1], [], []>} : vector<8x128xf32>, vector<128x128xf32>, vector<8x128xf32> -> vector<8x128xf32>
    %37 = arith.subf %35, %36 : vector<8x128xf32>
    %38 = vector.broadcast %11 : f32 to vector<8x128xf32>
    %39 = arith.mulf %38, %24 : vector<8x128xf32>
    %cst_28 = arith.constant dense<0.000000e+00> : vector<8x128xf32>
    %40 = tpu.matmul %39, %25, %cst_28 {dimension_numbers = #tpu.dot_dimension_numbers<[1], [0], [0], [1], [0, 0, 1, 1], [], []>} : vector<8x128xf32>, vector<128x128xf32>, vector<8x128xf32> -> vector<8x128xf32>
    %41 = vector.broadcast %8 : f32 to vector<8x128xf32>
    %42 = arith.mulf %41, %29 : vector<8x128xf32>
    %43 = arith.addf %40, %42 : vector<8x128xf32>
    %cst_29 = arith.constant dense<0.000000e+00> : vector<8x128xf32>
    %44 = tpu.matmul %43, %25, %cst_29 {dimension_numbers = #tpu.dot_dimension_numbers<[1], [0], [0], [1], [0, 0, 1, 1], [], []>} : vector<8x128xf32>, vector<128x128xf32>, vector<8x128xf32> -> vector<8x128xf32>
    %45 = vector.broadcast %5 : f32 to vector<8x128xf32>
    %46 = arith.mulf %45, %33 : vector<8x128xf32>
    %47 = arith.addf %44, %46 : vector<8x128xf32>
    %cst_30 = arith.constant dense<0.000000e+00> : vector<8x128xf32>
    %48 = tpu.matmul %47, %25, %cst_30 {dimension_numbers = #tpu.dot_dimension_numbers<[1], [0], [0], [1], [0, 0, 1, 1], [], []>} : vector<8x128xf32>, vector<128x128xf32>, vector<8x128xf32> -> vector<8x128xf32>
    %49 = vector.broadcast %2 : f32 to vector<8x128xf32>
    %50 = arith.mulf %49, %37 : vector<8x128xf32>
    %51 = arith.addf %48, %50 : vector<8x128xf32>
    %c0_31 = arith.constant 0 : index
    %c0_32 = arith.constant 0 : index
    %52 = vector.load %arg7[%c0_31, %c0_32] : memref<8x128xf32, #tpu.memory_space<vmem>>, vector<8x128xf32>
    tpu.vector_store %arg7[%c0_31, %c0_32], %51 {strides = array<i32>} : memref<8x128xf32, #tpu.memory_space<vmem>>, vector<8x128xf32>,
    return
  }
}

</mosaic_0001>

<bundles_post_ra>
// kernel: tpu_custom_call.1
= control target key start
LH: loop header
LB: loop body
LE: loop exit
PB: predicated region body
PF: predicated region fallthrough
CT: control target
= control target key end

     0   :  { %12 = vsyncpa [#allocation5], 0  ;;  %s1521_s0 = inlined_call_operand.vmem [shape: f32[4], index: 0, kind: input, shape index: {}]   ;;  %s1522_s1 = inlined_call_operand.vmem [shape: f32[16,128], index: 1, kind: input, shape index: {}]   ;;  %s1523_s2 = inlined_call_operand.vmem [shape: f32[32,16], index: 2, kind: input, shape index: {}]   ;;  %s1524_s3 = inlined_call_operand.vmem [shape: f32[32,1], index: 3, kind: input, shape index: {}]   ;;  %s1525_s4 = inlined_call_operand.vmem [shape: f32[8,32], index: 4, kind: input, shape index: {}]   ;;  %s1526_s5 = inlined_call_operand.vmem [shape: f32[8,1], index: 5, kind: input, shape index: {}]   ;;  %s1527_s6 = inlined_call_operand.hbm [shape: f32[128,128], index: 6, kind: input, shape index: {}]   ;;  %s1528_s7 = inlined_call_operand.hbm [shape: f32[8,128], index: 7, kind: output, shape index: {}]  }
   0x1   :  { %13 = vsyncpa [#allocation3], 0 }
   0x2   :  { %14 = vsyncpa [#allocation4], 0  ;;  %s21_s26 = sshll.u32 %s1521_s0, 4  ;;  %s22_s26 = int_to_ptr.vmem [resolvable:$true] %s21_s26 }
   0x3   :  { %s1109_s27 = scalar_lea.vmem %s22_s26, 16  ;;  %p1114_p1 = scmp.lt.s32.totalorder %s22_s26, %s22_s26 }
   0x4   :  { %p1110_p0 = scmp.ne.s32.totalorder %s22_s26, %s1109_s27  ;;  %p1115_p2 = scmp.lt.s32.totalorder %s1109_s27, %s1109_s27 }
   0x6   :  { %p1116_p3 = por %p1115_p2, %p1114_p1 }
   0x8   :  { %p1117_p4 = pnand %p1116_p3, %p1110_p0 }
   0xa   :  { %1120 = shalt.err (!%p1117_p4)
}
   0xb   :  { %s1167_s28 = smov [#allocation2]   ;;  %s1168_s29 = smov [#allocation6]  }
   0xc   :  { %24 = dma.vmem_to_smem %s22_s26, 16, %s1167_s28, [#allocation5]  }
   0xd   :  { %s40_s30 = sshll.u32 %s1168_s29, 4  ;;  %s41_s30 = int_to_ptr.vmem [resolvable:$true] %s40_s30 }
   0xe   :  { %s1129_s8 = scalar_lea.vmem %s41_s30, 2048  ;;  %p1134_p6 = scmp.lt.s32.totalorder %s41_s30, %s41_s30 }
   0xf   :  { %p1130_p5 = scmp.ne.s32.totalorder %s41_s30, %s1129_s8  ;;  %p1135_p7 = scmp.lt.s32.totalorder %s1129_s8, %s1129_s8 }
  0x11   :  { %p1136_p8 = por %p1135_p7, %p1134_p6 }
  0x13   :  { %p1137_p9 = pnand %p1136_p8, %p1130_p5 }
  0x15   :  { %1140 = shalt.err (!%p1137_p9)
}
  0x16   :  { %s1169_s0 = smov 128   ;;  %s1170_s9 = smov 8  }
  0x17   :  { %46 = dma.hbm_to_vmem [thread:$0]  %s1527_s6, 2048, %s41_s30, [#allocation3], %s1169_s0, %s1169_s0, %s1170_s9  }
  0x18   :  { %1161 = dma.done.wait [#allocation5], 16  }
  0x19   :  { %1162 = vsyncadd [#allocation5], 4294967280 }
  0x1a   :  { %1163 = dma.done.wait [#allocation3], 2048  }
  0x1b   :  { %1164 = vsyncadd [#allocation3], 4294965248 }
  0x1c   :  { %53 = sfence }
  0x1d   :  { %v71_v0 = vld [vmem:[%s1522_s1 + $0x8] sm:$0xff]  ;;  %v70_v1 = vld [vmem:[%s1522_s1] sm:$0xff]  ;;  %vm96_vm0 = vcmask 130048   ;;  %v1171_v4 = vmov 0   ;;  %v75_v5 = vld [vmem:[%s1524_s3 + $0x18] sm:$0xff]  ;;  %v1172_v12 = vmov 0.0  }
  0x1e   :  { %v66_v2 = vld [vmem:[%s1523_s2] sm:$0xff]  ;;  %867 = vmatprep.subr.mxu0 %v71_v0  ;;  %v67_v3 = vld [vmem:[%s1523_s2 + $0x8] sm:$0xff]  ;;  %1107 = vset.pattern.permute.xlu0 %v1171_v4  ;;  %v68_v7 = vld [vmem:[%s1523_s2 + $0x10] sm:$0xff]  ;;  %vm1173_vm1 = vmmov 0   ;;  %vm205_vm2 = vcmask 261120   ;;  %s747_s10 = sld [smem:[#allocation2 + $0x2]] }
  0x1f   :  { %871 = vmatprep.mubr.msk.f32.mxu0 %vm96_vm0, %v66_v2  ;;  %868 = vmatpush3.msra.mxu0 %v71_v0  ;;  %v73_v6 = vld [vmem:[%s1524_s3 + $0x8] sm:$0xff]  ;;  %v74_v8 = vld [vmem:[%s1524_s3 + $0x10] sm:$0xff]  ;;  %v69_v9 = vld [vmem:[%s1523_s2 + $0x18] sm:$0xff]  ;;  %s746_s13 = sld [smem:[#allocation2 + $0x1]]  ;;  %s1175_s18 = smov [#allocation7]  }
  0x20   :  { %869 = vmatprep.subr.mxu0 %v70_v1  ;;  %93 = vperm.xlu0 %1107, %v75_v5   ;;  %v72_v10 = vld [vmem:[%s1524_s3] sm:$0xff]  ;;  %v1265_v13 = vld [vmem:[#allocation6 + $0x78] sm:$0xff]  ;;  %v1267_v14 = vld [vmem:[#allocation6 + $0x70] sm:$0xff]  ;;  %s54_s16 = sld [smem:[#allocation2]]  ;;  %s736_s19 = sshll.u32 %s1175_s18, 4  ;;  %s737_s19 = int_to_ptr.vmem [resolvable:$true] %s736_s19 }
  0x21   :  { %870 = vmatpush3.msra.mxu0 %v70_v1  ;;  %1108 = vset.pattern.permute.xlu1 %v1171_v4  ;;  %v199_v11 = vld [vmem:[%s1526_s5] sm:$0xff]  ;;  %v1271_v15 = vld [vmem:[#allocation6 + $0x68] sm:$0xff]  ;;  %v1279_v17 = vld [vmem:[#allocation6 + $0x58] sm:$0xff]  ;;  %s1174_s5 = smov 0.0   ;;  %s1141_s20 = scalar_lea.vmem %s737_s19, 128 }
  0x22   :  { %872 = vmatmul.mubr.msk.f32.vlgmr.msra.gmra.mxu0 %vm96_vm0, %v67_v3  ;;  %83 = vperm.xlu1 %1108, %v73_v6   ;;  %v1275_v16 = vld [vmem:[#allocation6 + $0x60] sm:$0xff]  ;;  %v1283_v18 = vld [vmem:[#allocation6 + $0x50] sm:$0xff]  ;;  %v1287_v19 = vld [vmem:[#allocation6 + $0x48] sm:$0xff]  ;;  %p1142_p10 = scmp.ne.s32.totalorder %s737_s19, %s1141_s20  ;;  %p1146_p11 = scmp.lt.s32.totalorder %s737_s19, %s737_s19 }
  0x23   :  { %874 = vmatprep.mubr.msk.f32.mxu0 %vm96_vm0, %v68_v7  ;;  %877 = vmatprep.subr.mxu1 %v1172_v12  ;;  %v1291_v20 = vld [vmem:[#allocation6 + $0x40] sm:$0xff]  ;;  %v1295_v21 = vld [vmem:[#allocation6 + $0x38] sm:$0xff]  ;;  %v1299_v22 = vld [vmem:[#allocation6 + $0x30] sm:$0xff]  ;;  %p1147_p12 = scmp.lt.s32.totalorder %s1141_s20, %s1141_s20 }
  0x24   :  { %88 = vperm.xlu0 %1107, %v74_v8   ;;  %888 = vmatprep.subr.mxu0 %v1172_v12  ;;  %v1303_v23 = vld [vmem:[#allocation6 + $0x28] sm:$0xff]  ;;  %v1307_v24 = vld [vmem:[#allocation6 + $0x20] sm:$0xff]  ;;  %v1311_v25 = vld [vmem:[#allocation6 + $0x18] sm:$0xff]  ;;  %s61_s11 = smax.f32 %s1174_s5, %s747_s10 }
  0x25   :  { %885 = vmatprep.mubr.msk.f32.mxu1 %vm1173_vm1, %v1172_v12  ;;  %889 = vmatpush3.msra.mxu0 %v1265_v13  ;;  %v1315_v26 = vld [vmem:[#allocation6 + $0x10] sm:$0xff]  ;;  %v198_v43 = vld [vmem:[%s1525_s4] sm:$0xff]  ;;  %v1358_v44 = vld [vmem:[#allocation6 + $0x8] sm:$0xff]  ;;  %s748_s4 = sld [smem:[#allocation2 + $0x3]]  ;;  %s62_s12 = smul.f32 0.375, %s61_s11 }
  0x26   :  { %875 = vmatmul.mubr.msk.f32.gmra.mxu0 %vm96_vm0, %v69_v9  ;;  %78 = vperm.xlu1 %1108, %v72_v10   ;;  %v1363_v45 = vld [vmem:[#allocation6] sm:$0xff]  ;;  %s58_s14 = smax.f32 %s1174_s5, %s746_s13  ;;  %s55_s17 = smax.f32 %s1174_s5, %s54_s16 }
  0x27   :  { %920 = vmatprep.mubr.msk.f32.mxu0 %vm1173_vm1, %v1172_v12  ;;  %890 = vmatprep.subr.mxu0 %v1172_v12  ;;  %v513_v60 = vstv %s62_s12  ;;  %s59_s15 = smul.f32 0.375, %s58_s14  ;;  %p1148_p13 = por %p1147_p12, %p1146_p11 }
  0x28   :  { %202 = vperm.xlu0 %1107, %v199_v11   ;;  %891 = vmatpush3.msra.mxu0 %v1267_v14  ;;  %s56_s6 = smul.f32 0.125, %s55_s17 }
  0x29   :  { %892 = vmatprep.subr.mxu0 %v1172_v12  ;;  %v585_v5 = vstv %s59_s15  ;;  %p1149_p0 = pnand %p1148_p13, %p1142_p10 }
  0x2a   :  { %893 = vmatpush3.msra.mxu0 %v1271_v15  ;;  %v657_v10 = vstv %s56_s6 }
  0x2b   :  { %894 = vmatprep.subr.mxu0 %v1172_v12  ;;  %s64_s0 = smax.f32 %s1174_s5, %s748_s4 }
  0x2c   :  { %895 = vmatpush3.msra.mxu0 %v1275_v16  ;;  %s65_s9 = smul.f32 0.125, %s64_s0 }
  0x2d   :  { %896 = vmatprep.subr.mxu0 %v1172_v12 }
  0x2e   :  { %897 = vmatpush3.msra.mxu0 %v1279_v17  ;;  %v511_v54 = vstv %s65_s9 }
  0x2f   :  { %898 = vmatprep.subr.mxu0 %v1172_v12 }
  0x30   :  { %899 = vmatpush3.msra.mxu0 %v1283_v18 }
  0x31   :  { %900 = vmatprep.subr.mxu0 %v1172_v12 }
  0x32   :  { %901 = vmatpush3.msra.mxu0 %v1287_v19 }
  0x33   :  { %902 = vmatprep.subr.mxu0 %v1172_v12 }
  0x34   :  { %903 = vmatpush3.msra.mxu0 %v1291_v20 }
  0x35   :  { %904 = vmatprep.subr.mxu0 %v1172_v12 }
  0x36   :  { %905 = vmatpush3.msra.mxu0 %v1295_v21 }
  0x37   :  { %906 = vmatprep.subr.mxu0 %v1172_v12 }
  0x38   :  { %907 = vmatpush3.msra.mxu0 %v1299_v22 }
  0x39   :  { %908 = vmatprep.subr.mxu0 %v1172_v12 }
  0x3a   :  { %909 = vmatpush3.msra.mxu0 %v1303_v23 }
  0x3b   :  { %910 = vmatprep.subr.mxu0 %v1172_v12 }
  0x3c   :  { %911 = vmatpush3.msra.mxu0 %v1307_v24 }
  0x3d   :  { %912 = vmatprep.subr.mxu0 %v1172_v12 }
  0x3e   :  { %913 = vmatpush3.msra.mxu0 %v1311_v25 }
  0x3f   :  { %914 = vmatprep.subr.mxu0 %v1172_v12 }
  0x40   :  { %915 = vmatpush3.msra.mxu0 %v1315_v26 }
  0x41   :  { %916 = vmatprep.subr.mxu0 %v1172_v12 }
  0x42   :  { %917 = vmatpush3.msra.mxu0 %v1358_v44 }
  0x43   :  { %918 = vmatprep.subr.mxu0 %v1172_v12 }
  0x44   :  { %919 = vmatpush3.msra.mxu0 %v1363_v45 }
  0x45   :  { %958 = vmatprep.subr.mxu0 %v1172_v12 }
  0x9b   :  { %v94_v27 = vpop.permute.xlu0 %93 }
  0x9d   :  { %v84_v28 = vpop.permute.xlu1 %83 }
  0x9f   :  { %v89_v32 = vpop.permute.xlu0 %88 }
  0xa1   :  { %v79_v34 = vpop.permute.xlu1 %78 }
  0xa3   :  { %v203_v46 = vpop.permute.xlu0 %202 }
  0xe2   :  { %v873_v29 = vpop.f32.mrf.mxu0 }
  0xe3   :  { %v181_v36 = vadd.f32 %v873_v29, %v84_v28 }
  0xe4   :  { %v175_v30 = vpop.f32.mrf.mxu0 }
  0xe5   :  { %v176_v39 = vadd.f32 %v175_v30, %v79_v34  ;;  %v195_v41 = vmax.f32 %v181_v36, 0.0 }
  0xe6   :  { %v876_v31 = vpop.f32.mrf.mxu0 }
  0xe7   :  { %v191_v33 = vadd.f32 %v876_v31, %v94_v27  ;;  %v194_v42 = vmax.f32 %v176_v39, 0.0 }
  0xe8   :  { %v185_v35 = vpop.f32.mrf.mxu0 }
  0xe9   :  { %v197_v37 = vmax.f32 %v191_v33, 0.0  ;;  %v186_v38 = vadd.f32 %v185_v35, %v89_v32 }
  0xeb   :  { %v196_v40 = vmax.f32 %v186_v38, 0.0  ;;  %878 = vmatpush3.msra.mxu1 %v197_v37 }
  0xec   :  { %879 = vmatprep.subr.mxu1 %v1172_v12 }
  0xed   :  { %880 = vmatpush3.msra.mxu1 %v196_v40 }
  0xee   :  { %881 = vmatprep.subr.mxu1 %v1172_v12 }
  0xef   :  { %882 = vmatpush3.msra.mxu1 %v195_v41 }
  0xf0   :  { %883 = vmatprep.subr.mxu1 %v1172_v12 }
  0xf1   :  { %884 = vmatpush3.msra.mxu1 %v194_v42 }
  0xf2   :  { %886 = vmatmul.mubr.msk.f32.vlgmr.msra.gmra.mxu1 %vm205_vm2, %v198_v43  ;;  %923 = vmatprep.subr.mxu1 %v1172_v12 }
  0xf3   :  { %924 = vmatpush3.msra.mxu1 %v1265_v13  ;;  %955 = vmatprep.mubr.msk.f32.mxu1 %vm1173_vm1, %v1172_v12 }
  0xf4   :  { %925 = vmatprep.subr.mxu1 %v1172_v12 }
  0xf5   :  { %926 = vmatpush3.msra.mxu1 %v1267_v14 }
  0xf6   :  { %927 = vmatprep.subr.mxu1 %v1172_v12 }
  0xf7   :  { %928 = vmatpush3.msra.mxu1 %v1271_v15 }
  0xf8   :  { %929 = vmatprep.subr.mxu1 %v1172_v12 }
  0xf9   :  { %930 = vmatpush3.msra.mxu1 %v1275_v16 }
  0xfa   :  { %931 = vmatprep.subr.mxu1 %v1172_v12 }
  0xfb   :  { %932 = vmatpush3.msra.mxu1 %v1279_v17 }
  0xfc   :  { %933 = vmatprep.subr.mxu1 %v1172_v12 }
  0xfd   :  { %934 = vmatpush3.msra.mxu1 %v1283_v18 }
  0xfe   :  { %935 = vmatprep.subr.mxu1 %v1172_v12 }
  0xff   :  { %936 = vmatpush3.msra.mxu1 %v1287_v19 }
 0x100   :  { %937 = vmatprep.subr.mxu1 %v1172_v12 }
 0x101   :  { %938 = vmatpush3.msra.mxu1 %v1291_v20 }
 0x102   :  { %939 = vmatprep.subr.mxu1 %v1172_v12 }
 0x103   :  { %940 = vmatpush3.msra.mxu1 %v1295_v21 }
 0x104   :  { %941 = vmatprep.subr.mxu1 %v1172_v12 }
 0x105   :  { %942 = vmatpush3.msra.mxu1 %v1299_v22 }
 0x106   :  { %943 = vmatprep.subr.mxu1 %v1172_v12 }
 0x107   :  { %944 = vmatpush3.msra.mxu1 %v1303_v23 }
 0x108   :  { %945 = vmatprep.subr.mxu1 %v1172_v12 }
 0x109   :  { %946 = vmatpush3.msra.mxu1 %v1307_v24 }
 0x10a   :  { %947 = vmatprep.subr.mxu1 %v1172_v12 }
 0x10b   :  { %948 = vmatpush3.msra.mxu1 %v1311_v25 }
 0x10c   :  { %949 = vmatprep.subr.mxu1 %v1172_v12 }
 0x10d   :  { %950 = vmatpush3.msra.mxu1 %v1315_v26 }
 0x10e   :  { %951 = vmatprep.subr.mxu1 %v1172_v12 }
 0x10f   :  { %952 = vmatpush3.msra.mxu1 %v1358_v44 }
 0x110   :  { %953 = vmatprep.subr.mxu1 %v1172_v12 }
 0x111   :  { %954 = vmatpush3.msra.mxu1 %v1363_v45 }
 0x112   :  { %993 = vmatprep.subr.mxu1 %v1172_v12 }
 0x1b2   :  { %v275_v47 = vpop.f32.mrf.mxu1 }
 0x1b3   :  { %v1370_v48 = vadd.f32 %v275_v47, %v203_v46 }
 0x1b4   :  { %v887_v49 = vpop.f32.mrf.mxu1 }
 0x1b5   :  { %921 = vmatmul.mubr.f32.vlgmr.msra.gmra.mxu0 %v1370_v48  ;;  %v295_v50 = vmul.f32 2.0, %v1370_v48  ;;  %v512_v55 = vmul.f32 %v511_v54, %v1370_v48 }
 0x1b6   :  { %959 = vmatpush3.msra.mxu0 %v1265_v13  ;;  %990 = vmatprep.mubr.msk.f32.mxu0 %vm1173_vm1, %v1172_v12 }
 0x1b7   :  { %960 = vmatprep.subr.mxu0 %v1172_v12 }
 0x1b8   :  { %961 = vmatpush3.msra.mxu0 %v1267_v14 }
 0x1b9   :  { %962 = vmatprep.subr.mxu0 %v1172_v12 }
 0x1ba   :  { %963 = vmatpush3.msra.mxu0 %v1271_v15 }
 0x1bb   :  { %964 = vmatprep.subr.mxu0 %v1172_v12 }
 0x1bc   :  { %965 = vmatpush3.msra.mxu0 %v1275_v16 }
 0x1bd   :  { %966 = vmatprep.subr.mxu0 %v1172_v12 }
 0x1be   :  { %967 = vmatpush3.msra.mxu0 %v1279_v17 }
 0x1bf   :  { %968 = vmatprep.subr.mxu0 %v1172_v12 }
 0x1c0   :  { %969 = vmatpush3.msra.mxu0 %v1283_v18 }
 0x1c1   :  { %970 = vmatprep.subr.mxu0 %v1172_v12 }
 0x1c2   :  { %971 = vmatpush3.msra.mxu0 %v1287_v19 }
 0x1c3   :  { %972 = vmatprep.subr.mxu0 %v1172_v12 }
 0x1c4   :  { %973 = vmatpush3.msra.mxu0 %v1291_v20 }
 0x1c5   :  { %974 = vmatprep.subr.mxu0 %v1172_v12 }
 0x1c6   :  { %975 = vmatpush3.msra.mxu0 %v1295_v21 }
 0x1c7   :  { %976 = vmatprep.subr.mxu0 %v1172_v12 }
 0x1c8   :  { %977 = vmatpush3.msra.mxu0 %v1299_v22 }
 0x1c9   :  { %978 = vmatprep.subr.mxu0 %v1172_v12 }
 0x1ca   :  { %979 = vmatpush3.msra.mxu0 %v1303_v23 }
 0x1cb   :  { %980 = vmatprep.subr.mxu0 %v1172_v12 }
 0x1cc   :  { %981 = vmatpush3.msra.mxu0 %v1307_v24 }
 0x1cd   :  { %982 = vmatprep.subr.mxu0 %v1172_v12 }
 0x1ce   :  { %983 = vmatpush3.msra.mxu0 %v1311_v25 }
 0x1cf   :  { %984 = vmatprep.subr.mxu0 %v1172_v12 }
 0x1d0   :  { %985 = vmatpush3.msra.mxu0 %v1315_v26 }
 0x1d1   :  { %986 = vmatprep.subr.mxu0 %v1172_v12 }
 0x1d2   :  { %987 = vmatpush3.msra.mxu0 %v1358_v44 }
 0x1d3   :  { %988 = vmatprep.subr.mxu0 %v1172_v12 }
 0x1d4   :  { %989 = vmatpush3.msra.mxu0 %v1363_v45 }
 0x1d5   :  { %1028 = vmatprep.subr.mxu0 %v1172_v12 }
 0x275   :  { %v362_v51 = vpop.f32.mrf.mxu0 }
 0x276   :  { %v1408_v52 = vsub.f32 %v295_v50, %v362_v51 }
 0x277   :  { %v922_v53 = vpop.f32.mrf.mxu0 }
 0x278   :  { %956 = vmatmul.mubr.f32.vlgmr.msra.gmra.mxu1 %v1408_v52  ;;  %v367_v56 = vmul.f32 2.0, %v1408_v52  ;;  %v514_v61 = vmul.f32 %v513_v60, %v1408_v52 }
 0x279   :  { %994 = vmatpush3.msra.mxu1 %v1265_v13  ;;  %1025 = vmatprep.mubr.msk.f32.mxu1 %vm1173_vm1, %v1172_v12 }
 0x27a   :  { %995 = vmatprep.subr.mxu1 %v1172_v12 }
 0x27b   :  { %996 = vmatpush3.msra.mxu1 %v1267_v14 }
 0x27c   :  { %997 = vmatprep.subr.mxu1 %v1172_v12 }
 0x27d   :  { %998 = vmatpush3.msra.mxu1 %v1271_v15 }
 0x27e   :  { %999 = vmatprep.subr.mxu1 %v1172_v12 }
 0x27f   :  { %1000 = vmatpush3.msra.mxu1 %v1275_v16 }
 0x280   :  { %1001 = vmatprep.subr.mxu1 %v1172_v12 }
 0x281   :  { %1002 = vmatpush3.msra.mxu1 %v1279_v17 }
 0x282   :  { %1003 = vmatprep.subr.mxu1 %v1172_v12 }
 0x283   :  { %1004 = vmatpush3.msra.mxu1 %v1283_v18 }
 0x284   :  { %1005 = vmatprep.subr.mxu1 %v1172_v12 }
 0x285   :  { %1006 = vmatpush3.msra.mxu1 %v1287_v19 }
 0x286   :  { %1007 = vmatprep.subr.mxu1 %v1172_v12 }
 0x287   :  { %1008 = vmatpush3.msra.mxu1 %v1291_v20 }
 0x288   :  { %1009 = vmatprep.subr.mxu1 %v1172_v12 }
 0x289   :  { %1010 = vmatpush3.msra.mxu1 %v1295_v21 }
 0x28a   :  { %1011 = vmatprep.subr.mxu1 %v1172_v12 }
 0x28b   :  { %1012 = vmatpush3.msra.mxu1 %v1299_v22 }
 0x28c   :  { %1013 = vmatprep.subr.mxu1 %v1172_v12 }
 0x28d   :  { %1014 = vmatpush3.msra.mxu1 %v1303_v23 }
 0x28e   :  { %1015 = vmatprep.subr.mxu1 %v1172_v12 }
 0x28f   :  { %1016 = vmatpush3.msra.mxu1 %v1307_v24 }
 0x290   :  { %1017 = vmatprep.subr.mxu1 %v1172_v12 }
 0x291   :  { %1018 = vmatpush3.msra.mxu1 %v1311_v25 }
 0x292   :  { %1019 = vmatprep.subr.mxu1 %v1172_v12 }
 0x293   :  { %1020 = vmatpush3.msra.mxu1 %v1315_v26 }
 0x294   :  { %1021 = vmatprep.subr.mxu1 %v1172_v12 }
 0x295   :  { %1022 = vmatpush3.msra.mxu1 %v1358_v44 }
 0x296   :  { %1023 = vmatprep.subr.mxu1 %v1172_v12 }
 0x297   :  { %1024 = vmatpush3.msra.mxu1 %v1363_v45 }
 0x298   :  { %1026 = vmatmul.mubr.f32.vlgmr.msra.gmra.mxu1 %v512_v55  ;;  %1063 = vmatprep.subr.mxu1 %v1172_v12 }
 0x299   :  { %1064 = vmatpush3.msra.mxu1 %v1265_v13  ;;  %1095 = vmatprep.mubr.msk.f32.mxu1 %vm1173_vm1, %v1172_v12 }
 0x29a   :  { %1065 = vmatprep.subr.mxu1 %v1172_v12 }
 0x29b   :  { %1066 = vmatpush3.msra.mxu1 %v1267_v14 }
 0x29c   :  { %1067 = vmatprep.subr.mxu1 %v1172_v12 }
 0x29d   :  { %1068 = vmatpush3.msra.mxu1 %v1271_v15 }
 0x29e   :  { %1069 = vmatprep.subr.mxu1 %v1172_v12 }
 0x29f   :  { %1070 = vmatpush3.msra.mxu1 %v1275_v16 }
 0x2a0   :  { %1071 = vmatprep.subr.mxu1 %v1172_v12 }
 0x2a1   :  { %1072 = vmatpush3.msra.mxu1 %v1279_v17 }
 0x2a2   :  { %1073 = vmatprep.subr.mxu1 %v1172_v12 }
 0x2a3   :  { %1074 = vmatpush3.msra.mxu1 %v1283_v18 }
 0x2a4   :  { %1075 = vmatprep.subr.mxu1 %v1172_v12 }
 0x2a5   :  { %1076 = vmatpush3.msra.mxu1 %v1287_v19 }
 0x2a6   :  { %1077 = vmatprep.subr.mxu1 %v1172_v12 }
 0x2a7   :  { %1078 = vmatpush3.msra.mxu1 %v1291_v20 }
 0x2a8   :  { %1079 = vmatprep.subr.mxu1 %v1172_v12 }
 0x2a9   :  { %1080 = vmatpush3.msra.mxu1 %v1295_v21 }
 0x2aa   :  { %1081 = vmatprep.subr.mxu1 %v1172_v12 }
 0x2ab   :  { %1082 = vmatpush3.msra.mxu1 %v1299_v22 }
 0x2ac   :  { %1083 = vmatprep.subr.mxu1 %v1172_v12 }
 0x2ad   :  { %1084 = vmatpush3.msra.mxu1 %v1303_v23 }
 0x2ae   :  { %1085 = vmatprep.subr.mxu1 %v1172_v12 }
 0x2af   :  { %1086 = vmatpush3.msra.mxu1 %v1307_v24 }
 0x2b0   :  { %1087 = vmatprep.subr.mxu1 %v1172_v12 }
 0x2b1   :  { %1088 = vmatpush3.msra.mxu1 %v1311_v25 }
 0x2b2   :  { %1089 = vmatprep.subr.mxu1 %v1172_v12 }
 0x2b3   :  { %1090 = vmatpush3.msra.mxu1 %v1315_v26 }
 0x2b4   :  { %1091 = vmatprep.subr.mxu1 %v1172_v12 }
 0x2b5   :  { %1092 = vmatpush3.msra.mxu1 %v1358_v44 }
 0x2b6   :  { %1093 = vmatprep.subr.mxu1 %v1172_v12 }
 0x2b7   :  { %1094 = vmatpush3.msra.mxu1 %v1363_v45 }
 0x338   :  { %v434_v57 = vpop.f32.mrf.mxu1 }
 0x339   :  { %v438_v58 = vsub.f32 %v367_v56, %v434_v57 }
 0x33a   :  { %v957_v59 = vpop.f32.mrf.mxu1 }
 0x33b   :  { %991 = vmatmul.mubr.f32.vlgmr.msra.gmra.mxu0 %v438_v58  ;;  %v439_v1 = vmul.f32 2.0, %v438_v58  ;;  %v586_v6 = vmul.f32 %v585_v5, %v438_v58 }
 0x33c   :  { %1029 = vmatpush3.msra.mxu0 %v1265_v13  ;;  %1060 = vmatprep.mubr.msk.f32.mxu0 %vm1173_vm1, %v1172_v12 }
 0x33d   :  { %1030 = vmatprep.subr.mxu0 %v1172_v12 }
 0x33e   :  { %1031 = vmatpush3.msra.mxu0 %v1267_v14 }
 0x33f   :  { %1032 = vmatprep.subr.mxu0 %v1172_v12 }
 0x340   :  { %1033 = vmatpush3.msra.mxu0 %v1271_v15 }
 0x341   :  { %1034 = vmatprep.subr.mxu0 %v1172_v12 }
 0x342   :  { %1035 = vmatpush3.msra.mxu0 %v1275_v16 }
 0x343   :  { %1036 = vmatprep.subr.mxu0 %v1172_v12 }
 0x344   :  { %1037 = vmatpush3.msra.mxu0 %v1279_v17 }
 0x345   :  { %1038 = vmatprep.subr.mxu0 %v1172_v12 }
 0x346   :  { %1039 = vmatpush3.msra.mxu0 %v1283_v18 }
 0x347   :  { %1040 = vmatprep.subr.mxu0 %v1172_v12 }
 0x348   :  { %1041 = vmatpush3.msra.mxu0 %v1287_v19 }
 0x349   :  { %1042 = vmatprep.subr.mxu0 %v1172_v12 }
 0x34a   :  { %1043 = vmatpush3.msra.mxu0 %v1291_v20 }
 0x34b   :  { %1044 = vmatprep.subr.mxu0 %v1172_v12 }
 0x34c   :  { %1045 = vmatpush3.msra.mxu0 %v1295_v21 }
 0x34d   :  { %1046 = vmatprep.subr.mxu0 %v1172_v12 }
 0x34e   :  { %1047 = vmatpush3.msra.mxu0 %v1299_v22 }
 0x34f   :  { %1048 = vmatprep.subr.mxu0 %v1172_v12 }
 0x350   :  { %1049 = vmatpush3.msra.mxu0 %v1303_v23 }
 0x351   :  { %1050 = vmatprep.subr.mxu0 %v1172_v12 }
 0x352   :  { %1051 = vmatpush3.msra.mxu0 %v1307_v24 }
 0x353   :  { %1052 = vmatprep.subr.mxu0 %v1172_v12 }
 0x354   :  { %1053 = vmatpush3.msra.mxu0 %v1311_v25 }
 0x355   :  { %1054 = vmatprep.subr.mxu0 %v1172_v12 }
 0x356   :  { %1055 = vmatpush3.msra.mxu0 %v1315_v26 }
 0x357   :  { %1056 = vmatprep.subr.mxu0 %v1172_v12 }
 0x358   :  { %v581_v62 = vpop.f32.mrf.mxu1  ;;  %1057 = vmatpush3.msra.mxu0 %v1358_v44 }
 0x359   :  { %v582_v63 = vadd.f32 %v581_v62, %v514_v61  ;;  %1058 = vmatprep.subr.mxu0 %v1172_v12 }
 0x35a   :  { %v1027_v0 = vpop.f32.mrf.mxu1  ;;  %1059 = vmatpush3.msra.mxu0 %v1363_v45 }
 0x35b   :  { %1061 = vmatmul.mubr.f32.vlgmr.msra.gmra.mxu0 %v582_v63 }
 0x3fb   :  { %v506_v2 = vpop.f32.mrf.mxu0 }
 0x3fc   :  { %v510_v3 = vsub.f32 %v439_v1, %v506_v2 }
 0x3fd   :  { %v992_v4 = vpop.f32.mrf.mxu0 }
 0x3fe   :  { %v658_v11 = vmul.f32 %v657_v10, %v510_v3 }
 0x41b   :  { %v653_v7 = vpop.f32.mrf.mxu0 }
 0x41c   :  { %v654_v8 = vadd.f32 %v653_v7, %v586_v6 }
 0x41d   :  { %v1062_v9 = vpop.f32.mrf.mxu0 }
 0x41e   :  { %1096 = vmatmul.mubr.f32.vlgmr.msra.gmra.mxu1 %v654_v8 }
 0x4de   :  { %v725_v12 = vpop.f32.mrf.mxu1 }
 0x4df   :  { %v726_v13 = vadd.f32 %v725_v12, %v658_v11 }
 0x4e0   :  { %v1097_v14 = vpop.f32.mrf.mxu1 }
 0x4e1   :  { %729 = vst [vmem:[#allocation7] sm:$0xff] %v726_v13 }
 0x4e2   :  { %1152 = shalt.err (!%p1149_p0)
}
 0x4e3   :  { %739 = dma.vmem_to_hbm [thread:$0]  %s737_s19, 128, %s1528_s7, [#allocation4]  }
 0x4e4   :  { %1165 = dma.done.wait [#allocation4], 128  }
 0x4e5   :  { %1166 = vsyncadd [#allocation4], 4294967168 }
 0x4e6   :  { %743 = vsyncpa [#allocation3], 1 }
 0x4e7   :  { %744 = vsyncpa [#allocation4], 1 }
 0x4e8   :  { %745 = vsyncpa [#allocation5], 1 }

</bundles_post_ra>
